<compile_context>
chip_gen: v7x
topology: tpu7x:2x2x1
jax: 0.10.0
libtpu: 0.0.40
codegen_flags: <defaults>
</compile_context>

<pallas_src>
import functools

import jax
import jax.numpy as jnp
from jax.experimental import pallas as pl
from jax.experimental.pallas import tpu as pltpu

# The PyTorch module's natural MNIST configuration.
INPUT_NUM = 784
HIDDEN_SIZE = 100
OUT_PUT = 10

_LANE = 128
_MAX_BLOCK_B = 1024


def _round_up(n, m):
    return ((n + m - 1) // m) * m


def _num_tensorcores():
    """2 TensorCores per chip on v7x-class devices, 1 on v5e/v6e (and fallback)."""
    try:
        kind = jax.devices()[0].device_kind.lower()
    except Exception:  # pragma: no cover - defensive
        return 1
    return 2 if "7" in kind else 1


def mlp_kernel(x_ref, w1_ref, b1_ref, w2_ref, b2_ref, o_ref):
    """Fused fc1 -> ReLU -> fc2 for one batch tile, everything in vregs.

    x_ref:  (block_b, D_in)    f32    streamed activations (cast to bf16 here)
    w1_ref: (D_in, H_p)        bf16   resident weights
    b1_ref: (1, H_p)           f32
    w2_ref: (H_p, D_out_p)     bf16
    b2_ref: (1, D_out_p)       f32
    o_ref:  (block_b, D_out_p) f32    lane-dense (D_out_p multiple of 128)
    """
    x = x_ref[...].astype(jnp.bfloat16)
    # fc1 on the MXU (bf16 inputs, f32 accumulation); bias + ReLU on the VPU.
    h = jnp.dot(x, w1_ref[...], preferred_element_type=jnp.float32)
    h = jnp.maximum(h + b1_ref[...], 0.0)
    # fc2 on the MXU; activation re-cast to bf16 to match the weights.
    out = jnp.dot(h.astype(w2_ref.dtype), w2_ref[...],
                  preferred_element_type=jnp.float32)
    o_ref[...] = (out + b2_ref[...]).astype(o_ref.dtype)


def prepare_params(w1, b1, w2, b2):
    """One-time weight prep: zero-pad H / D_out to lane multiples, cast to bf16.

    Padding is exact: padded hidden columns see zero w1 columns and zero bias
    (so ReLU gives 0), padded w2 rows are zero, padded output columns carry
    zero bias -> extra output columns are exactly 0 and can be sliced off.
    Weights are expected pre-transposed: [in_features, out_features].
    """
    d_in, h_dim = w1.shape
    d_out = w2.shape[1]
    h_p = _round_up(h_dim, _LANE)
    d_out_p = _round_up(d_out, _LANE)

    w1_p = jnp.pad(w1.astype(jnp.float32),
                   ((0, 0), (0, h_p - h_dim))).astype(jnp.bfloat16)
    b1_p = jnp.pad(b1.astype(jnp.float32).reshape(1, -1),
                   ((0, 0), (0, h_p - h_dim)))
    w2_p = jnp.pad(w2.astype(jnp.float32),
                   ((0, h_p - h_dim), (0, d_out_p - d_out))).astype(jnp.bfloat16)
    b2_p = jnp.pad(b2.astype(jnp.float32).reshape(1, -1),
                   ((0, 0), (0, d_out_p - d_out)))
    return w1_p, b1_p, w2_p, b2_p


@functools.partial(jax.jit,
                   static_argnames=("d_out", "block_b", "padded_output"))
def neural_net_forward(x, w1_p, b1_p, w2_p, b2_p, *, d_out,
                       block_b=None, padded_output=False):
    """Forward pass equivalent to fc2(relu(fc1(x))).

    x:    [B, D_in] float32 (unpadded, streamed as-is)
    w1_p: [D_in, H_p]   bf16 (from prepare_params)
    b1_p: [1, H_p]      f32
    w2_p: [H_p, D_out_p] bf16
    b2_p: [1, D_out_p]  f32
    Returns [B, d_out] f32, or the padded [b_p, D_out_p] block if
    padded_output=True (padding columns are exactly zero).
    """
    B, d_in = x.shape
    h_p = w1_p.shape[1]
    d_out_p = w2_p.shape[1]

    # One grid step per TensorCore (capped), so per-step pipeline overhead is
    # minimal on single-TC chips while v7x's second core still gets work.
    if block_b is None:
        block_b = min(_round_up(pl.cdiv(B, _num_tensorcores()), 16),
                      _MAX_BLOCK_B)
    assert block_b % 16 == 0, "batch tile must be a multiple of 16"

    b_p = _round_up(B, block_b)
    if b_p != B:
        x = jnp.pad(x, ((0, b_p - B), (0, 0)))

    grid = (b_p // block_b,)

    cost = pl.CostEstimate(
        flops=2 * b_p * (d_in * h_p + h_p * d_out_p),
        transcendentals=0,
        bytes_accessed=(b_p * d_in * 4            # x (f32, streamed)
                        + w1_p.size * 2 + w2_p.size * 2
                        + b1_p.size * 4 + b2_p.size * 4
                        + b_p * d_out_p * 4),     # output (f32)
    )

    out_p = pl.pallas_call(
        mlp_kernel,
        out_shape=jax.ShapeDtypeStruct((b_p, d_out_p), jnp.float32),
        grid_spec=pltpu.PrefetchScalarGridSpec(
            num_scalar_prefetch=0,
            grid=grid,
            in_specs=[
                # activations: the only streamed operand, tiled over batch;
                # last dim = full array dim (784), so no lane padding needed.
                pl.BlockSpec((block_b, d_in), lambda i: (i, 0)),
                # weights / biases: constant index_map -> the same block stays
                # resident in VMEM across the whole grid (no per-step refetch).
                pl.BlockSpec((d_in, h_p), lambda i: (0, 0)),
                pl.BlockSpec((1, h_p), lambda i: (0, 0)),
                pl.BlockSpec((h_p, d_out_p), lambda i: (0, 0)),
                pl.BlockSpec((1, d_out_p), lambda i: (0, 0)),
            ],
            out_specs=pl.BlockSpec((block_b, d_out_p), lambda i: (i, 0)),
        ),
        compiler_params=pltpu.CompilerParams(
            dimension_semantics=("parallel",),
        ),
        cost_estimate=cost,
    )(x, w1_p, b1_p, w2_p, b2_p)

    if padded_output:
        return out_p
    return out_p[:B, :d_out]


def init_params(key, input_num, hidden_size, out_put, dtype=jnp.float32):
    """Deterministic init mimicking nn.Linear's U(-1/sqrt(fan_in), 1/sqrt(fan_in)).

    Weights are stored already transposed: [in_features, out_features].
    """
    k1, k2, k3, k4 = jax.random.split(key, 4)
    bound1 = 1.0 / jnp.sqrt(jnp.asarray(input_num, dtype))
    bound2 = 1.0 / jnp.sqrt(jnp.asarray(hidden_size, dtype))
    w1 = jax.random.uniform(k1, (input_num, hidden_size), dtype, -bound1, bound1)
    b1 = jax.random.uniform(k2, (hidden_size,), dtype, -bound1, bound1)
    w2 = jax.random.uniform(k3, (hidden_size, out_put), dtype, -bound2, bound2)
    b2 = jax.random.uniform(k4, (out_put,), dtype, -bound2, bound2)
    return w1, b1, w2, b2


def reference_forward(x, w1, b1, w2, b2):
    # Reference uses the same bf16-rounded operands the kernel sees, with f32
    # accumulation, so the comparison is tight.
    xf = x.astype(jnp.bfloat16).astype(jnp.float32)
    w1f = w1.astype(jnp.bfloat16).astype(jnp.float32)
    w2f = w2.astype(jnp.bfloat16).astype(jnp.float32)
    h = jnp.maximum(xf @ w1f + b1.astype(jnp.float32), 0.0)
    return h @ w2f + b2.astype(jnp.float32)


if __name__ == "__main__":
    key = jax.random.PRNGKey(0)
    kx, kp = jax.random.split(key)

    batch = 128
    x = jax.random.normal(kx, (batch, INPUT_NUM), jnp.float32)
    w1, b1, w2, b2 = init_params(kp, INPUT_NUM, HIDDEN_SIZE, OUT_PUT)

    # One-time weight prep (padding/cast hoisted out of the forward path).
    w1_p, b1_p, w2_p, b2_p = jax.block_until_ready(
        prepare_params(w1, b1, w2, b2))

    out = neural_net_forward(x, w1_p, b1_p, w2_p, b2_p, d_out=OUT_PUT)
    out = jax.block_until_ready(out)

    ref = reference_forward(x, w1, b1, w2, b2)
    assert out.shape == (batch, OUT_PUT)
    assert jnp.allclose(out, ref, atol=1e-2, rtol=1e-2), "mismatch vs JAX reference"

    print("KERNEL_OK")
</pallas_src>

<mosaic_0001>
module attributes {stable_mosaic.version = 11 : i64} {
  func.func @mlp_kernel(%arg0: i32, %arg1: memref<128x784xf32, #tpu.memory_space<vmem>>, %arg2: memref<784x128xbf16, #tpu.memory_space<vmem>>, %arg3: memref<1x128xf32, #tpu.memory_space<vmem>>, %arg4: memref<128x128xbf16, #tpu.memory_space<vmem>>, %arg5: memref<1x128xf32, #tpu.memory_space<vmem>>, %arg6: memref<128x128xf32, #tpu.memory_space<vmem>>) attributes {dimension_semantics = [#tpu.dimension_semantics<parallel>], iteration_bounds = array<i64: 1>, scalar_prefetch = 0 : i64, scratch_operands = 0 : i64, tpu.core_type = #tpu.core_type<tc>, window_params = [{transform_indices = @transform_0, window_bounds = array<i64: 128, 784>}, {pipeline_mode = #tpu.pipeline_mode<synchronous>, transform_indices = @transform_1, window_bounds = array<i64: 784, 128>}, {pipeline_mode = #tpu.pipeline_mode<synchronous>, transform_indices = @transform_2, window_bounds = array<i64: 1, 128>}, {pipeline_mode = #tpu.pipeline_mode<synchronous>, transform_indices = @transform_3, window_bounds = array<i64: 128, 128>}, {pipeline_mode = #tpu.pipeline_mode<synchronous>, transform_indices = @transform_4, window_bounds = array<i64: 1, 128>}, {transform_indices = @transform_5, window_bounds = array<i64: 128, 128>}]} {
    %c0 = arith.constant 0 : index
    %c0_0 = arith.constant 0 : index
    %0 = vector.load %arg1[%c0, %c0_0] : memref<128x784xf32, #tpu.memory_space<vmem>>, vector<128x784xf32>
    %1 = arith.truncf %0 : vector<128x784xf32> to vector<128x784xbf16>
    %c0_1 = arith.constant 0 : index
    %c0_2 = arith.constant 0 : index
    %2 = vector.load %arg2[%c0_1, %c0_2] : memref<784x128xbf16, #tpu.memory_space<vmem>>, vector<784x128xbf16>
    %cst = arith.constant dense<0.000000e+00> : vector<128x128xf32>
    %3 = tpu.matmul %1, %2, %cst {dimension_numbers = #tpu.dot_dimension_numbers<[1], [0], [0], [1], [0, 0, 1, 1], [], []>} : vector<128x784xbf16>, vector<784x128xbf16>, vector<128x128xf32> -> vector<128x128xf32>
    %c0_3 = arith.constant 0 : index
    %c0_4 = arith.constant 0 : index
    %4 = vector.load %arg3[%c0_3, %c0_4] : memref<1x128xf32, #tpu.memory_space<vmem>>, vector<1x128xf32>
    %5 = vector.broadcast %4 : vector<1x128xf32> to vector<128x128xf32>
    %6 = arith.addf %3, %5 : vector<128x128xf32>
    %cst_5 = arith.constant 0.000000e+00 : f32
    %7 = vector.broadcast %cst_5 : f32 to vector<128x128xf32>
    %8 = arith.maximumf %6, %7 : vector<128x128xf32>
    %9 = arith.truncf %8 : vector<128x128xf32> to vector<128x128xbf16>
    %c0_6 = arith.constant 0 : index
    %c0_7 = arith.constant 0 : index
    %10 = vector.load %arg4[%c0_6, %c0_7] : memref<128x128xbf16, #tpu.memory_space<vmem>>, vector<128x128xbf16>
    %cst_8 = arith.constant dense<0.000000e+00> : vector<128x128xf32>
    %11 = tpu.matmul %9, %10, %cst_8 {dimension_numbers = #tpu.dot_dimension_numbers<[1], [0], [0], [1], [0, 0, 1, 1], [], []>} : vector<128x128xbf16>, vector<128x128xbf16>, vector<128x128xf32> -> vector<128x128xf32>
    %c0_9 = arith.constant 0 : index
    %c0_10 = arith.constant 0 : index
    %12 = vector.load %arg5[%c0_9, %c0_10] : memref<1x128xf32, #tpu.memory_space<vmem>>, vector<1x128xf32>
    %13 = vector.broadcast %12 : vector<1x128xf32> to vector<128x128xf32>
    %14 = arith.addf %11, %13 : vector<128x128xf32>
    %c0_11 = arith.constant 0 : index
    %c0_12 = arith.constant 0 : index
    %15 = vector.load %arg6[%c0_11, %c0_12] : memref<128x128xf32, #tpu.memory_space<vmem>>, vector<128x128xf32>
    tpu.vector_store %arg6[%c0_11, %c0_12], %14 {strides = array<i32>} : memref<128x128xf32, #tpu.memory_space<vmem>>, vector<128x128xf32>,
    return
  }
  func.func @transform_0(%arg0: i32) -> (i32, i32) {
    %c0_i32 = arith.constant 0 : i32
    %c0_i32_0 = arith.constant 0 : i32
    return %arg0, %c0_i32 : i32, i32
  }
  func.func @transform_1(%arg0: i32) -> (i32, i32) {
    %c0_i32 = arith.constant 0 : i32
    %c0_i32_0 = arith.constant 0 : i32
    %c0_i32_1 = arith.constant 0 : i32
    return %c0_i32, %c0_i32_0 : i32, i32
  }
  func.func @transform_2(%arg0: i32) -> (i32, i32) {
    %c0_i32 = arith.constant 0 : i32
    %c0_i32_0 = arith.constant 0 : i32
    %c0_i32_1 = arith.constant 0 : i32
    return %c0_i32, %c0_i32_0 : i32, i32
  }
  func.func @transform_3(%arg0: i32) -> (i32, i32) {
    %c0_i32 = arith.constant 0 : i32
    %c0_i32_0 = arith.constant 0 : i32
    %c0_i32_1 = arith.constant 0 : i32
    return %c0_i32, %c0_i32_0 : i32, i32
  }
  func.func @transform_4(%arg0: i32) -> (i32, i32) {
    %c0_i32 = arith.constant 0 : i32
    %c0_i32_0 = arith.constant 0 : i32
    %c0_i32_1 = arith.constant 0 : i32
    return %c0_i32, %c0_i32_0 : i32, i32
  }
  func.func @transform_5(%arg0: i32) -> (i32, i32) {
    %c0_i32 = arith.constant 0 : i32
    %c0_i32_0 = arith.constant 0 : i32
    return %arg0, %c0_i32 : i32, i32
  }
}

</mosaic_0001>

<bundles_post_ra>
// kernel: neural_net_forward.1
= control target key start
LH: loop header
LB: loop body
LE: loop exit
PB: predicated region body
PF: predicated region fallthrough
CT: control target
= control target key end

     0   :  { %vm588_vm0 = vcmask 130048   ;;  %s2272_s1 = inlined_call_operand.vmem [shape: bf16[784,128], index: 1, kind: input, shape index: {}]   ;;  %s2273_s0 = inlined_call_operand.vmem [shape: f32[128,784], index: 0, kind: input, shape index: {}]   ;;  %s2274_s3 = inlined_call_operand.vmem [shape: bf16[128,128], index: 3, kind: input, shape index: {}]   ;;  %s2275_s2 = inlined_call_operand.vmem [shape: f32[1,128], index: 2, kind: input, shape index: {}]   ;;  %s2276_s4 = inlined_call_operand.vmem [shape: f32[1,128], index: 4, kind: input, shape index: {}]   ;;  %s2277_s5 = inlined_call_operand.vmem [shape: f32[128,128], index: 5, kind: output, shape index: {}]  }
   0x1   :  { %v1547_v0 = vld [vmem:[%s2272_s1 + $0x40] sm:$0xff]   ;;  %v1551_v4 = vld [vmem:[%s2272_s1 + $0x48] sm:$0xff]   ;;  %v1555_v8 = vld [vmem:[%s2272_s1 + $0x50] sm:$0xff]  }
   0x2   :  { %v1548_v1 = vld [vmem:[%s2272_s1] sm:$0xff]   ;;  %1280 = vmatprep.subr.bf16.mxu0 %v1547_v0  ;;  %v1552_v5 = vld [vmem:[%s2272_s1 + $0x8] sm:$0xff]   ;;  %v1556_v9 = vld [vmem:[%s2272_s1 + $0x10] sm:$0xff]  }
   0x3   :  { %v1549_v2 = vld [vmem:[%s2272_s1 + $0xc0] sm:$0xff]   ;;  %1281 = vmatpush3.bf16.msra.mxu0 %v1548_v1  ;;  %v1553_v6 = vld [vmem:[%s2272_s1 + $0xc8] sm:$0xff]   ;;  %v1557_v10 = vld [vmem:[%s2272_s1 + $0xd0] sm:$0xff]  }
   0x4   :  { %v1550_v3 = vld [vmem:[%s2272_s1 + $0x80] sm:$0xff]   ;;  %1344 = vmatprep.subr.bf16.mxu1 %v1549_v2  ;;  %1282 = vmatprep.subr.bf16.mxu0 %v1551_v4  ;;  %v1554_v7 = vld [vmem:[%s2272_s1 + $0x88] sm:$0xff]   ;;  %v1558_v11 = vld [vmem:[%s2272_s1 + $0x90] sm:$0xff]  }
   0x5   :  { %1345 = vmatpush3.bf16.msra.mxu1 %v1550_v3  ;;  %v1559_v12 = vld [vmem:[%s2272_s1 + $0x58] sm:$0xff]   ;;  %v1563_v16 = vld [vmem:[%s2272_s1 + $0x60] sm:$0xff]   ;;  %v1567_v20 = vld [vmem:[%s2272_s1 + $0x68] sm:$0xff]  }
   0x6   :  { %1346 = vmatprep.subr.bf16.mxu1 %v1553_v6  ;;  %v1560_v13 = vld [vmem:[%s2272_s1 + $0x18] sm:$0xff]   ;;  %v1564_v17 = vld [vmem:[%s2272_s1 + $0x20] sm:$0xff]   ;;  %v1568_v21 = vld [vmem:[%s2272_s1 + $0x28] sm:$0xff]  }
   0x7   :  { %1283 = vmatpush3.bf16.msra.mxu0 %v1552_v5  ;;  %v1561_v14 = vld [vmem:[%s2272_s1 + $0xd8] sm:$0xff]   ;;  %v1565_v18 = vld [vmem:[%s2272_s1 + $0xe0] sm:$0xff]   ;;  %v1569_v22 = vld [vmem:[%s2272_s1 + $0xe8] sm:$0xff]  }
   0x8   :  { %1284 = vmatprep.subr.bf16.mxu0 %v1555_v8  ;;  %v1562_v15 = vld [vmem:[%s2272_s1 + $0x98] sm:$0xff]   ;;  %v1566_v19 = vld [vmem:[%s2272_s1 + $0xa0] sm:$0xff]   ;;  %v1570_v23 = vld [vmem:[%s2272_s1 + $0xa8] sm:$0xff]  }
   0x9   :  { %1347 = vmatpush3.bf16.msra.mxu1 %v1554_v7  ;;  %v1571_v24 = vld [vmem:[%s2272_s1 + $0x70] sm:$0xff]   ;;  %v1575_v28 = vld [vmem:[%s2272_s1 + $0x78] sm:$0xff]   ;;  %v22_v31 = vld [vmem:[%s2273_s0 + $0x8] sm:$0xff] }
   0xa   :  { %1348 = vmatprep.subr.bf16.mxu1 %v1557_v10  ;;  %v1572_v25 = vld [vmem:[%s2272_s1 + $0x30] sm:$0xff]   ;;  %v1576_v29 = vld [vmem:[%s2272_s1 + $0x38] sm:$0xff]   ;;  %v29_v32 = vld [vmem:[%s2273_s0 + $0x40] sm:$0xff] }
   0xb   :  { %1285 = vmatpush3.bf16.msra.mxu0 %v1556_v9  ;;  %v1573_v26 = vld [vmem:[%s2272_s1 + $0xf0] sm:$0xff]   ;;  %v1577_v30 = vld [vmem:[%s2272_s1 + $0xf8] sm:$0xff]   ;;  %v134_v33 = vpack.c.bf16 %v29_v32, %v22_v31  ;;  %v21_v35 = vld [vmem:[%s2273_s0] sm:$0xff] }
   0xc   :  { %1286 = vmatprep.subr.bf16.mxu0 %v1559_v12  ;;  %v1574_v27 = vld [vmem:[%s2272_s1 + $0xb0] sm:$0xff]   ;;  %v1578_v34 = vld [vmem:[%s2272_s1 + $0xb8] sm:$0xff]   ;;  %v1579_v38 = vld [vmem:[%s2272_s1 + $0x140] sm:$0xff]  }
   0xd   :  { %1349 = vmatpush3.bf16.msra.mxu1 %v1558_v11  ;;  %v28_v36 = vld [vmem:[%s2273_s0 + $0x38] sm:$0xff]  ;;  %645 = vmatprep.mubr.bf16.mxu0 %v134_v33  ;;  %v31_v40 = vld [vmem:[%s2273_s0 + $0x50] sm:$0xff]  ;;  %v1580_v42 = vld [vmem:[%s2272_s1 + $0x100] sm:$0xff]  }
   0xe   :  { %1350 = vmatprep.subr.bf16.mxu1 %v1561_v14  ;;  %v133_v37 = vpack.c.bf16 %v28_v36, %v21_v35  ;;  %v24_v39 = vld [vmem:[%s2273_s0 + $0x18] sm:$0xff]  ;;  %v23_v43 = vld [vmem:[%s2273_s0 + $0x10] sm:$0xff]  ;;  %v30_v44 = vld [vmem:[%s2273_s0 + $0x48] sm:$0xff] }
   0xf   :  { %1287 = vmatpush3.bf16.msra.mxu0 %v1560_v13  ;;  %v136_v41 = vpack.c.bf16 %v31_v40, %v24_v39  ;;  %v36_v45 = vld [vmem:[%s2273_s0 + $0x78] sm:$0xff]  ;;  %v135_v46 = vpack.c.bf16 %v30_v44, %v23_v43  ;;  %v43_v47 = vld [vmem:[%s2273_s0 + $0xb0] sm:$0xff]  ;;  %v42_v49 = vld [vmem:[%s2273_s0 + $0xa8] sm:$0xff] }
  0x10   :  { %1288 = vmatprep.subr.bf16.mxu0 %v1563_v16  ;;  %v35_v48 = vld [vmem:[%s2273_s0 + $0x70] sm:$0xff]  ;;  %v141_v50 = vpack.c.bf16 %v43_v47, %v36_v45  ;;  %v1581_v51 = vld [vmem:[%s2272_s1 + $0x148] sm:$0xff]   ;;  %v45_v53 = vld [vmem:[%s2273_s0 + $0xc0] sm:$0xff] }
  0x11   :  { %1351 = vmatpush3.bf16.msra.mxu1 %v1562_v15  ;;  %742 = vmatprep.mubr.bf16.mxu1 %v136_v41  ;;  %v38_v52 = vld [vmem:[%s2273_s0 + $0x88] sm:$0xff]  ;;  %v140_v54 = vpack.c.bf16 %v42_v49, %v35_v48  ;;  %v37_v57 = vld [vmem:[%s2273_s0 + $0x80] sm:$0xff]  ;;  %v44_v58 = vld [vmem:[%s2273_s0 + $0xb8] sm:$0xff] }
  0x12   :  { %1352 = vmatprep.subr.bf16.mxu1 %v1565_v18  ;;  %v143_v55 = vpack.c.bf16 %v45_v53, %v38_v52  ;;  %v1582_v56 = vld [vmem:[%s2272_s1 + $0x108] sm:$0xff]   ;;  %v57_v60 = vld [vmem:[%s2273_s0 + $0x120] sm:$0xff]  ;;  %v142_v62 = vpack.c.bf16 %v44_v58, %v37_v57  ;;  %v1583_v63 = vld [vmem:[%s2272_s1 + $0x150] sm:$0xff]  }
  0x13   :  { %1289 = vmatpush3.bf16.msra.mxu0 %v1564_v17  ;;  %v50_v59 = vld [vmem:[%s2273_s0 + $0xe8] sm:$0xff]  ;;  %v52_v0 = vld [vmem:[%s2273_s0 + $0xf8] sm:$0xff]  ;;  %v59_v1 = vld [vmem:[%s2273_s0 + $0x130] sm:$0xff] }
  0x14   :  { %1290 = vmatprep.subr.bf16.mxu0 %v1567_v20  ;;  %v148_v61 = vpack.c.bf16 %v57_v60, %v50_v59  ;;  %v49_v2 = vld [vmem:[%s2273_s0 + $0xe0] sm:$0xff]  ;;  %v56_v3 = vld [vmem:[%s2273_s0 + $0x118] sm:$0xff]  ;;  %v150_v4 = vpack.c.bf16 %v59_v1, %v52_v0  ;;  %v1584_v5 = vld [vmem:[%s2272_s1 + $0x110] sm:$0xff]  }
  0x15   :  { %1353 = vmatpush3.bf16.msra.mxu1 %v1566_v19  ;;  %v51_v6 = vld [vmem:[%s2273_s0 + $0xf0] sm:$0xff]  ;;  %v64_v7 = vld [vmem:[%s2273_s0 + $0x158] sm:$0xff]  ;;  %v58_v9 = vld [vmem:[%s2273_s0 + $0x128] sm:$0xff]  ;;  %v147_v10 = vpack.c.bf16 %v56_v3, %v49_v2 }
  0x16   :  { %1354 = vmatprep.subr.bf16.mxu1 %v1569_v22  ;;  %v71_v8 = vld [vmem:[%s2273_s0 + $0x190] sm:$0xff]  ;;  %v1585_v11 = vld [vmem:[%s2272_s1 + $0x158] sm:$0xff]   ;;  %v66_v12 = vld [vmem:[%s2273_s0 + $0x168] sm:$0xff]  ;;  %v149_v16 = vpack.c.bf16 %v58_v9, %v51_v6 }
  0x17   :  { %1291 = vmatpush3.bf16.msra.mxu0 %v1568_v21  ;;  %v73_v13 = vld [vmem:[%s2273_s0 + $0x1a0] sm:$0xff]  ;;  %v155_v14 = vpack.c.bf16 %v71_v8, %v64_v7  ;;  %v1586_v15 = vld [vmem:[%s2272_s1 + $0x118] sm:$0xff]   ;;  %v63_v17 = vld [vmem:[%s2273_s0 + $0x150] sm:$0xff] }
  0x18   :  { %1292 = vmatprep.subr.bf16.mxu0 %v1571_v24  ;;  %v157_v18 = vpack.c.bf16 %v73_v13, %v66_v12  ;;  %v1587_v19 = vld [vmem:[%s2272_s1 + $0x160] sm:$0xff]   ;;  %v70_v20 = vld [vmem:[%s2273_s0 + $0x188] sm:$0xff]  ;;  %v84_v36 = vld [vmem:[%s2273_s0 + $0x1f8] sm:$0xff] }
  0x19   :  { %1355 = vmatpush3.bf16.msra.mxu1 %v1570_v23  ;;  %v78_v21 = vld [vmem:[%s2273_s0 + $0x1c8] sm:$0xff]  ;;  %v85_v22 = vld [vmem:[%s2273_s0 + $0x200] sm:$0xff]  ;;  %v154_v24 = vpack.c.bf16 %v70_v20, %v63_v17  ;;  %v79_v39 = vld [vmem:[%s2273_s0 + $0x1d0] sm:$0xff] }
  0x1a   :  { %1356 = vmatprep.subr.bf16.mxu1 %v1573_v26  ;;  %v1588_v23 = vld [vmem:[%s2272_s1 + $0x120] sm:$0xff]   ;;  %v72_v26 = vld [vmem:[%s2273_s0 + $0x198] sm:$0xff]  ;;  %v1590_v31 = vld [vmem:[%s2272_s1 + $0x168] sm:$0xff]  }
  0x1b   :  { %1293 = vmatpush3.bf16.msra.mxu0 %v1572_v25  ;;  %v65_v25 = vld [vmem:[%s2273_s0 + $0x160] sm:$0xff]  ;;  %v86_v40 = vld [vmem:[%s2273_s0 + $0x208] sm:$0xff]  ;;  %v1592_v41 = vld [vmem:[%s2272_s1 + $0x170] sm:$0xff]  }
  0x1c   :  { %1294 = vmatprep.subr.bf16.mxu0 %v1575_v28  ;;  %v162_v28 = vpack.c.bf16 %v85_v22, %v78_v21  ;;  %v156_v32 = vpack.c.bf16 %v72_v26, %v65_v25  ;;  %v77_v35 = vld [vmem:[%s2273_s0 + $0x1c0] sm:$0xff]  ;;  %v1593_v43 = vld [vmem:[%s2272_s1 + $0x130] sm:$0xff]   ;;  %v94_v45 = vld [vmem:[%s2273_s0 + $0x248] sm:$0xff]  ;;  %v163_v47 = vpack.c.bf16 %v86_v40, %v79_v39 }
  0x1d   :  { %1357 = vmatpush3.bf16.msra.mxu1 %v1574_v27  ;;  %v1589_v27 = vld [vmem:[%s2272_s1 + $0x180] sm:$0xff]   ;;  %v1594_v48 = vld [vmem:[%s2272_s1 + $0x178] sm:$0xff]   ;;  %v91_v49 = vld [vmem:[%s2273_s0 + $0x230] sm:$0xff] }
  0x1e   :  { %1358 = vmatprep.subr.bf16.mxu1 %v1577_v30  ;;  %v87_v30 = vld [vmem:[%s2273_s0 + $0x210] sm:$0xff]  ;;  %v1595_v52 = vld [vmem:[%s2272_s1 + $0x138] sm:$0xff]   ;;  %v106_v53 = vld [vmem:[%s2273_s0 + $0x2a8] sm:$0xff] }
  0x1f   :  { %1295 = vmatpush3.bf16.msra.mxu0 %v1576_v29  ;;  %v80_v29 = vld [vmem:[%s2273_s0 + $0x1d8] sm:$0xff]  ;;  %v115_v60 = vld [vmem:[%s2273_s0 + $0x2f0] sm:$0xff]  ;;  %v122_v7 = vld [vmem:[%s2273_s0 + $0x328] sm:$0xff] }
  0x20   :  { %1408 = vmatprep.subr.bf16.mxu0 %v1579_v38  ;;  %v164_v33 = vpack.c.bf16 %v87_v30, %v80_v29  ;;  %v99_v38 = vld [vmem:[%s2273_s0 + $0x270] sm:$0xff]  ;;  %v100_v57 = vld [vmem:[%s2273_s0 + $0x278] sm:$0xff]  ;;  %v129_v8 = vld [vmem:[%s2273_s0 + $0x360] sm:$0xff] }
  0x21   :  { %1359 = vmatpush3.bf16.msra.mxu1 %v1578_v34  ;;  %v1591_v34 = vld [vmem:[%s2272_s1 + $0x128] sm:$0xff]   ;;  %v108_v59 = vld [vmem:[%s2273_s0 + $0x2b8] sm:$0xff]  ;;  %v127_v2 = vld [vmem:[%s2273_s0 + $0x350] sm:$0xff] }
  0x22   :  { %646 = vmatmul.mubr.bf16.vlgmr.msra.gmra.mrb[0].mxu0 %v133_v37  ;;  %1497 = vmatprep.subr.bf16.mxu1 %v1589_v27  ;;  %v92_v37 = vld [vmem:[%s2273_s0 + $0x238] sm:$0xff]  ;;  %v126_v12 = vld [vmem:[%s2273_s0 + $0x348] sm:$0xff]  ;;  %v47_v26 = vld [vmem:[%s2273_s0 + $0xd0] sm:$0xff] }
  0x23   :  { %1409 = vmatpush3.bf16.msra.mxu0 %v1580_v42  ;;  %653 = vmatprep.mubr.bf16.mxu0 %v141_v50  ;;  %v161_v42 = vpack.c.bf16 %v84_v36, %v77_v35  ;;  %v169_v44 = vpack.c.bf16 %v99_v38, %v92_v37  ;;  %v112_v0 = vld [vmem:[%s2273_s0 + $0x2d8] sm:$0xff]  ;;  %v26_v13 = vld [vmem:[%s2273_s0 + $0x28] sm:$0xff]  ;;  %v39_v35 = vld [vmem:[%s2273_s0 + $0x90] sm:$0xff] }
  0x24   :  { %743 = vmatmul.mubr.bf16.vlgmr.msra.gmra.mrb[0].mxu1 %v135_v46  ;;  %1410 = vmatprep.subr.bf16.mxu0 %v1581_v51  ;;  %v101_v46 = vld [vmem:[%s2273_s0 + $0x280] sm:$0xff]  ;;  %v98_v51 = vld [vmem:[%s2273_s0 + $0x268] sm:$0xff]  ;;  %v120_v1 = vld [vmem:[%s2273_s0 + $0x318] sm:$0xff] }
  0x25   :  { %750 = vmatprep.mubr.bf16.mxu1 %v143_v55  ;;  %1498 = vmatpush3.bf16.msra.mxu1 %v1589_v27  ;;  %v171_v50 = vpack.c.bf16 %v101_v46, %v94_v45  ;;  %v168_v55 = vpack.c.bf16 %v98_v51, %v91_v49  ;;  %v183_v6 = vpack.c.bf16 %v127_v2, %v120_v1  ;;  %v128_v17 = vld [vmem:[%s2273_s0 + $0x358] sm:$0xff]  ;;  %v34_v20 = vld [vmem:[%s2273_s0 + $0x68] sm:$0xff]  ;;  %v61_v38 = vld [vmem:[%s2273_s0 + $0x140] sm:$0xff] }
  0x26   :  { %v40_v25 = vld [vmem:[%s2273_s0 + $0x98] sm:$0xff]  ;;  %v46_v36 = vld [vmem:[%s2273_s0 + $0xc8] sm:$0xff]  ;;  %v69_v40 = vld [vmem:[%s2273_s0 + $0x180] sm:$0xff] }
  0x27   :  { %1411 = vmatpush3.bf16.msra.mxu0 %v1582_v56  ;;  %v93_v56 = vld [vmem:[%s2273_s0 + $0x240] sm:$0xff]  ;;  %v48_v29 = vld [vmem:[%s2273_s0 + $0xd8] sm:$0xff]  ;;  %v145_v30 = vpack.c.bf16 %v47_v26, %v40_v25  ;;  %v54_v37 = vld [vmem:[%s2273_s0 + $0x108] sm:$0xff]  ;;  %v144_v39 = vpack.c.bf16 %v46_v36, %v39_v35 }
  0x28   :  { %1412 = vmatprep.subr.bf16.mxu0 %v1583_v63  ;;  %v105_v63 = vld [vmem:[%s2273_s0 + $0x2a0] sm:$0xff]  ;;  %v68_v49 = vld [vmem:[%s2273_s0 + $0x178] sm:$0xff]  ;;  %v1597_v26 = vld [vmem:[%s2274_s3 + $0x8] sm:$0xff]  }
  0x29   :  { %v175_v3 = vpack.c.bf16 %v112_v0, %v105_v63  ;;  %v125_v0 = vld [vmem:[%s2273_s0 + $0x340] sm:$0xff]  ;;  %v132_v1 = vld [vmem:[%s2273_s0 + $0x378] sm:$0xff] }
  0x2a   :  { %654 = vmatmul.mubr.bf16.gmra.mrb[4].mxu0 %v140_v54  ;;  %v113_v54 = vld [vmem:[%s2273_s0 + $0x2e0] sm:$0xff] }
  0x2b   :  { %661 = vmatprep.mubr.bf16.mxu0 %v148_v61  ;;  %1413 = vmatpush3.bf16.msra.mxu0 %v1584_v5  ;;  %v176_v58 = vpack.c.bf16 %v113_v54, %v106_v53  ;;  %v170_v61 = vpack.c.bf16 %v100_v57, %v93_v56  ;;  %v114_v5 = vld [vmem:[%s2273_s0 + $0x2e8] sm:$0xff]  ;;  %v104_v53 = vld [vmem:[%s2273_s0 + $0x298] sm:$0xff]  ;;  %v1596_v25 = vld [vmem:[%s2274_s3] sm:$0xff]  }
  0x2c   :  { %751 = vmatmul.mubr.bf16.gmra.mrb[4].mxu1 %v142_v62  ;;  %1414 = vmatprep.subr.bf16.mxu0 %v1585_v11  ;;  %v178_v62 = vpack.c.bf16 %v115_v60, %v108_v59  ;;  %v119_v11 = vld [vmem:[%s2273_s0 + $0x310] sm:$0xff]  ;;  %v118_v56 = vld [vmem:[%s2273_s0 + $0x308] sm:$0xff] }
  0x2d   :  { %758 = vmatprep.mubr.bf16.mxu1 %v150_v4  ;;  %v107_v4 = vld [vmem:[%s2273_s0 + $0x2b0] sm:$0xff]  ;;  %v74_v60 = vld [vmem:[%s2273_s0 + $0x1a8] sm:$0xff]  ;;  %1515 = vmatprep.subr.bf16.mxu1 %v1596_v25 }
  0x2e   :  { %v177_v9 = vpack.c.bf16 %v114_v5, %v107_v4  ;;  %v67_v59 = vld [vmem:[%s2273_s0 + $0x170] sm:$0xff]  ;;  %v81_v4 = vld [vmem:[%s2273_s0 + $0x1e0] sm:$0xff]  ;;  %v88_v5 = vld [vmem:[%s2273_s0 + $0x218] sm:$0xff] }
  0x2f   :  { %1415 = vmatpush3.bf16.msra.mxu0 %v1586_v15  ;;  %v182_v15 = vpack.c.bf16 %v126_v12, %v119_v11  ;;  %v158_v63 = vpack.c.bf16 %v74_v60, %v67_v59  ;;  %v102_v11 = vld [vmem:[%s2273_s0 + $0x288] sm:$0xff] }
  0x30   :  { %1416 = vmatprep.subr.bf16.mxu0 %v1587_v19  ;;  %v27_v19 = vld [vmem:[%s2273_s0 + $0x30] sm:$0xff]  ;;  %v110_v12 = vld [vmem:[%s2273_s0 + $0x2c8] sm:$0xff] }
  0x31   :  { %v139_v22 = vpack.c.bf16 %v34_v20, %v27_v19  ;;  %v131_v19 = vld [vmem:[%s2273_s0 + $0x370] sm:$0xff] }
  0x32   :  { %662 = vmatmul.mubr.bf16.gmra.mrb[8].mxu0 %v147_v10  ;;  %v185_v10 = vpack.c.bf16 %v129_v8, %v122_v7  ;;  %v103_v7 = vld [vmem:[%s2273_s0 + $0x290] sm:$0xff]  ;;  %v165_v8 = vpack.c.bf16 %v88_v5, %v81_v4 }
  0x33   :  { %669 = vmatprep.mubr.bf16.mxu0 %v155_v14  ;;  %1417 = vmatpush3.bf16.msra.mxu0 %v1588_v23  ;;  %v33_v14 = vld [vmem:[%s2273_s0 + $0x60] sm:$0xff] }
  0x34   :  { %759 = vmatmul.mubr.bf16.gmra.mrb[8].mxu1 %v149_v16  ;;  %1418 = vmatprep.subr.bf16.mxu0 %v1590_v31  ;;  %v121_v16 = vld [vmem:[%s2273_s0 + $0x320] sm:$0xff]  ;;  %v55_v31 = vld [vmem:[%s2273_s0 + $0x110] sm:$0xff] }
  0x35   :  { %766 = vmatprep.mubr.bf16.mxu1 %v157_v18  ;;  %v138_v18 = vpack.c.bf16 %v33_v14, %v26_v13  ;;  %v184_v21 = vpack.c.bf16 %v128_v17, %v121_v16  ;;  %v25_v23 = vld [vmem:[%s2273_s0 + $0x20] sm:$0xff]  ;;  %v116_v17 = vld [vmem:[%s2273_s0 + $0x2f8] sm:$0xff] }
  0x36   :  { %v117_v13 = vld [vmem:[%s2273_s0 + $0x300] sm:$0xff] }
  0x37   :  { %1419 = vmatpush3.bf16.msra.mxu0 %v1591_v34  ;;  %v109_v16 = vld [vmem:[%s2273_s0 + $0x2c0] sm:$0xff] }
  0x38   :  { %1420 = vmatprep.subr.bf16.mxu0 %v1592_v41  ;;  %v76_v41 = vld [vmem:[%s2273_s0 + $0x1b8] sm:$0xff]  ;;  %v179_v20 = vpack.c.bf16 %v116_v17, %v109_v16 }
  0x39   :  { %v160_v45 = vpack.c.bf16 %v76_v41, %v69_v40 }
  0x3a   :  { %670 = vmatmul.mubr.bf16.gmra.mrb[12].mxu0 %v154_v24  ;;  %v32_v24 = vld [vmem:[%s2273_s0 + $0x58] sm:$0xff] }
  0x3b   :  { %677 = vmatprep.mubr.bf16.mxu0 %v162_v28  ;;  %1421 = vmatpush3.bf16.msra.mxu0 %v1593_v43  ;;  %v137_v27 = vpack.c.bf16 %v32_v24, %v25_v23  ;;  %v41_v28 = vld [vmem:[%s2273_s0 + $0xa0] sm:$0xff]  ;;  %v83_v43 = vld [vmem:[%s2273_s0 + $0x1f0] sm:$0xff]  ;;  %v130_v23 = vld [vmem:[%s2273_s0 + $0x368] sm:$0xff] }
  0x3c   :  { %767 = vmatmul.mubr.bf16.gmra.mrb[12].mxu1 %v156_v32  ;;  %1422 = vmatprep.subr.bf16.mxu0 %v1594_v48  ;;  %v62_v32 = vld [vmem:[%s2273_s0 + $0x148] sm:$0xff]  ;;  %v60_v48 = vld [vmem:[%s2273_s0 + $0x138] sm:$0xff] }
  0x3d   :  { %774 = vmatprep.mubr.bf16.mxu1 %v164_v33  ;;  %v146_v33 = vpack.c.bf16 %v48_v29, %v41_v28  ;;  %v153_v34 = vpack.c.bf16 %v62_v32, %v55_v31  ;;  %v1599_v28 = vld [vmem:[%s2274_s3 + $0x18] sm:$0xff]   ;;  %v1600_v29 = vld [vmem:[%s2274_s3 + $0x20] sm:$0xff]   ;;  %v1602_v31 = vld [vmem:[%s2274_s3 + $0x30] sm:$0xff]  }
  0x3e   :  { %v1603_v32 = vld [vmem:[%s2274_s3 + $0x38] sm:$0xff]  }
  0x3f   :  { %1423 = vmatpush3.bf16.msra.mxu0 %v1595_v52  ;;  %v97_v52 = vld [vmem:[%s2273_s0 + $0x260] sm:$0xff] }
  0x40   :  { %v174_v57 = vpack.c.bf16 %v104_v53, %v97_v52 }
  0x42   :  { %678 = vmatmul.mubr.bf16.gmra.mrb[16].mxu0 %v161_v42  ;;  %v152_v42 = vpack.c.bf16 %v61_v38, %v54_v37 }
  0x43   :  { %685 = vmatprep.mubr.bf16.mxu0 %v169_v44  ;;  %v90_v44 = vld [vmem:[%s2273_s0 + $0x228] sm:$0xff] }
  0x44   :  { %775 = vmatmul.mubr.bf16.gmra.mrb[16].mxu1 %v163_v47  ;;  %v167_v46 = vpack.c.bf16 %v90_v44, %v83_v43  ;;  %v53_v47 = vld [vmem:[%s2273_s0 + $0x100] sm:$0xff] }
  0x45   :  { %782 = vmatprep.mubr.bf16.mxu1 %v171_v50  ;;  %v75_v50 = vld [vmem:[%s2273_s0 + $0x1b0] sm:$0xff]  ;;  %v151_v51 = vpack.c.bf16 %v60_v48, %v53_v47 }
  0x46   :  { %v159_v54 = vpack.c.bf16 %v75_v50, %v68_v49 }
  0x4a   :  { %686 = vmatmul.mubr.bf16.gmra.mrb[20].mxu0 %v168_v55  ;;  %v111_v55 = vld [vmem:[%s2273_s0 + $0x2d0] sm:$0xff] }
  0x4b   :  { %693 = vmatprep.mubr.bf16.mxu0 %v176_v58  ;;  %v181_v58 = vpack.c.bf16 %v118_v56, %v111_v55 }
  0x4c   :  { %783 = vmatmul.mubr.bf16.gmra.mrb[20].mxu1 %v170_v61  ;;  %v82_v61 = vld [vmem:[%s2273_s0 + $0x1e8] sm:$0xff] }
  0x4d   :  { %790 = vmatprep.mubr.bf16.mxu1 %v178_v62  ;;  %v89_v62 = vld [vmem:[%s2273_s0 + $0x220] sm:$0xff] }
  0x4e   :  { %v166_v2 = vpack.c.bf16 %v89_v62, %v82_v61 }
  0x52   :  { %694 = vmatmul.mubr.bf16.gmra.mrb[24].mxu0 %v175_v3  ;;  %v188_v3 = vpack.c.bf16 %v132_v1, %v125_v0 }
  0x53   :  { %701 = vmatprep.mubr.bf16.mxu0 %v183_v6  ;;  %v96_v6 = vld [vmem:[%s2273_s0 + $0x258] sm:$0xff] }
  0x54   :  { %791 = vmatmul.mubr.bf16.gmra.mrb[24].mxu1 %v177_v9  ;;  %v173_v9 = vpack.c.bf16 %v103_v7, %v96_v6 }
  0x55   :  { %798 = vmatprep.mubr.bf16.mxu1 %v185_v10  ;;  %v95_v10 = vld [vmem:[%s2273_s0 + $0x250] sm:$0xff] }
  0x56   :  { %v172_v14 = vpack.c.bf16 %v102_v11, %v95_v10 }
  0x5a   :  { %702 = vmatmul.mubr.bf16.gmra.mrb[28].mxu0 %v182_v15  ;;  %v180_v15 = vpack.c.bf16 %v117_v13, %v110_v12 }
  0x5b   :  { %839 = vmatprep.mubr.bf16.mxu0 %v138_v18  ;;  %v124_v18 = vld [vmem:[%s2273_s0 + $0x338] sm:$0xff] }
  0x5c   :  { %799 = vmatmul.mubr.bf16.gmra.mrb[28].mxu1 %v184_v21  ;;  %v187_v21 = vpack.c.bf16 %v131_v19, %v124_v18 }
  0x5d   :  { %1499 = vmatprep.mubr.msk.bf16.mxu1 %vm588_vm0, %v139_v22  ;;  %v123_v22 = vld [vmem:[%s2273_s0 + $0x330] sm:$0xff] }
  0x5e   :  { %v186_v24 = vpack.c.bf16 %v130_v23, %v123_v22 }
  0x62   :  { %840 = vmatmul.mubr.bf16.vlgmr.msra.gmra.mrb[32].mxu0 %v137_v27  ;;  %v1598_v27 = vld [vmem:[%s2274_s3 + $0x10] sm:$0xff]  }
  0x63   :  { %847 = vmatprep.mubr.bf16.mxu0 %v145_v30  ;;  %v1601_v30 = vld [vmem:[%s2274_s3 + $0x28] sm:$0xff]  }
  0x64   :  { %1500 = vmatmul.mubr.msk.bf16.vlgmr.msra.gmra.mrb[32].mxu1 %vm588_vm0, %v146_v33 }
  0x65   :  { %1503 = vmatprep.mubr.msk.bf16.mxu1 %vm588_vm0, %v153_v34  ;;  %1516 = vmatpush3.bf16.msra.mxu1 %v1596_v25  ;;  %v2152_v34 = vld [vmem:[%s2275_s2] ss:$0 sm:$0xff] }
  0x66   :  { %1517 = vmatprep.subr.bf16.mxu1 %v1597_v26 }
  0x69   :  { %1518 = vmatpush3.bf16.msra.mxu1 %v1597_v26 }
  0x6a   :  { %848 = vmatmul.mubr.bf16.gmra.mrb[36].mxu0 %v144_v39  ;;  %1519 = vmatprep.subr.bf16.mxu1 %v1598_v27 }
  0x6b   :  { %855 = vmatprep.mubr.bf16.mxu0 %v152_v42 }
  0x6c   :  { %1504 = vmatmul.mubr.msk.bf16.gmra.mrb[36].mxu1 %vm588_vm0, %v160_v45 }
  0x6d   :  { %1507 = vmatprep.mubr.msk.bf16.mxu1 %vm588_vm0, %v167_v46  ;;  %1520 = vmatpush3.bf16.msra.mxu1 %v1598_v27 }
  0x6e   :  { %1521 = vmatprep.subr.bf16.mxu1 %v1599_v28 }
  0x71   :  { %1522 = vmatpush3.bf16.msra.mxu1 %v1599_v28 }
  0x72   :  { %856 = vmatmul.mubr.bf16.gmra.mrb[40].mxu0 %v151_v51  ;;  %1523 = vmatprep.subr.bf16.mxu1 %v1600_v29 }
  0x73   :  { %863 = vmatprep.mubr.bf16.mxu0 %v159_v54 }
  0x74   :  { %1508 = vmatmul.mubr.msk.bf16.gmra.mrb[40].mxu1 %vm588_vm0, %v174_v57 }
  0x75   :  { %1511 = vmatprep.mubr.msk.bf16.mxu1 %vm588_vm0, %v181_v58  ;;  %1524 = vmatpush3.bf16.msra.mxu1 %v1600_v29 }
  0x76   :  { %1525 = vmatprep.subr.bf16.mxu1 %v1601_v30 }
  0x79   :  { %1526 = vmatpush3.bf16.msra.mxu1 %v1601_v30 }
  0x7a   :  { %864 = vmatmul.mubr.bf16.gmra.mrb[44].mxu0 %v158_v63  ;;  %1527 = vmatprep.subr.bf16.mxu1 %v1602_v31 }
  0x7b   :  { %871 = vmatprep.mubr.bf16.mxu0 %v166_v2 }
  0x7c   :  { %1512 = vmatmul.mubr.msk.bf16.gmra.mrb[44].mxu1 %vm588_vm0, %v188_v3 }
  0x7d   :  { %1528 = vmatpush3.bf16.msra.mxu1 %v1602_v31 }
  0x7e   :  { %1529 = vmatprep.subr.bf16.mxu1 %v1603_v32 }
  0x81   :  { %1530 = vmatpush3.bf16.msra.mxu1 %v1603_v32 }
  0x82   :  { %872 = vmatmul.mubr.bf16.gmra.mrb[48].mxu0 %v165_v8 }
  0x83   :  { %879 = vmatprep.mubr.bf16.mxu0 %v173_v9 }
  0x8a   :  { %880 = vmatmul.mubr.bf16.gmra.mrb[52].mxu0 %v172_v14 }
  0x8b   :  { %887 = vmatprep.mubr.bf16.mxu0 %v180_v15 }
  0x92   :  { %888 = vmatmul.mubr.bf16.gmra.mrb[56].mxu0 %v179_v20 }
  0x93   :  { %895 = vmatprep.mubr.bf16.mxu0 %v187_v21 }
  0x9a   :  { %896 = vmatmul.mubr.bf16.gmra.mrb[60].mxu0 %v186_v24 }
  0xf5   :  { %v1296_v33 = vpop.f32.mrb[0].mxu0 }
  0xf6   :  { %v1297_v35 = vpop.f32.mrb[1].mxu0 }
  0xf7   :  { %v1298_v36 = vadd.f32 %v1297_v35, %v1296_v33  ;;  %v1299_v37 = vpop.f32.mrb[2].mxu0  ;;  %v1360_v38 = vpop.f32.mrb[0].mxu1 }
  0xf8   :  { %v1300_v39 = vpop.f32.mrb[3].mxu0  ;;  %v1361_v42 = vpop.f32.mrb[1].mxu1 }
  0xf9   :  { %v648_v40 = vadd.f32 %v1298_v36, %v2152_v34  ;;  %v1301_v41 = vadd.f32 %v1300_v39, %v1299_v37  ;;  %v1362_v43 = vadd.f32 %v1361_v42, %v1360_v38  ;;  %v1363_v44 = vpop.f32.mrb[2].mxu1 }
  0xfa   :  { %v1364_v46 = vpop.f32.mrb[3].mxu1 }
  0xfb   :  { %v651_v45 = vadd.f32 %v1301_v41, %v2152_v34  ;;  %v2156_v47 = vadd.f32 %v1362_v43, %v648_v40  ;;  %v1365_v48 = vadd.f32 %v1364_v46, %v1363_v44 }
  0xfd   :  { %v1302_v49 = vpop.f32.mrb[4].mxu0  ;;  %v2158_v50 = vadd.f32 %v1365_v48, %v651_v45 }
  0xfe   :  { %v1303_v51 = vpop.f32.mrb[5].mxu0 }
  0xff   :  { %v1304_v52 = vadd.f32 %v1303_v51, %v1302_v49  ;;  %v1305_v53 = vpop.f32.mrb[6].mxu0  ;;  %v1366_v54 = vpop.f32.mrb[4].mxu1 }
 0x100   :  { %v1306_v55 = vpop.f32.mrb[7].mxu0  ;;  %v1367_v58 = vpop.f32.mrb[5].mxu1 }
 0x101   :  { %v656_v56 = vadd.f32 %v1304_v52, %v2152_v34  ;;  %v1307_v57 = vadd.f32 %v1306_v55, %v1305_v53  ;;  %v1368_v59 = vadd.f32 %v1367_v58, %v1366_v54  ;;  %v1369_v60 = vpop.f32.mrb[6].mxu1 }
 0x102   :  { %v1370_v62 = vpop.f32.mrb[7].mxu1 }
 0x103   :  { %v659_v61 = vadd.f32 %v1307_v57, %v2152_v34  ;;  %v2162_v63 = vadd.f32 %v1368_v59, %v656_v56  ;;  %v1371_v0 = vadd.f32 %v1370_v62, %v1369_v60 }
 0x105   :  { %v1308_v1 = vpop.f32.mrb[8].mxu0  ;;  %v2164_v2 = vadd.f32 %v1371_v0, %v659_v61 }
 0x106   :  { %v1309_v3 = vpop.f32.mrb[9].mxu0 }
 0x107   :  { %v1310_v4 = vadd.f32 %v1309_v3, %v1308_v1  ;;  %v1311_v5 = vpop.f32.mrb[10].mxu0  ;;  %v1372_v6 = vpop.f32.mrb[8].mxu1 }
 0x108   :  { %v1312_v7 = vpop.f32.mrb[11].mxu0  ;;  %v1373_v10 = vpop.f32.mrb[9].mxu1 }
 0x109   :  { %v664_v8 = vadd.f32 %v1310_v4, %v2152_v34  ;;  %v1313_v9 = vadd.f32 %v1312_v7, %v1311_v5  ;;  %v1374_v11 = vadd.f32 %v1373_v10, %v1372_v6  ;;  %v1375_v12 = vpop.f32.mrb[10].mxu1 }
 0x10a   :  { %v1376_v14 = vpop.f32.mrb[11].mxu1 }
 0x10b   :  { %v667_v13 = vadd.f32 %v1313_v9, %v2152_v34  ;;  %v2168_v15 = vadd.f32 %v1374_v11, %v664_v8  ;;  %v1377_v16 = vadd.f32 %v1376_v14, %v1375_v12 }
 0x10d   :  { %v1314_v17 = vpop.f32.mrb[12].mxu0  ;;  %v2170_v18 = vadd.f32 %v1377_v16, %v667_v13 }
 0x10e   :  { %v1315_v19 = vpop.f32.mrb[13].mxu0 }
 0x10f   :  { %v1316_v20 = vadd.f32 %v1315_v19, %v1314_v17  ;;  %v1317_v21 = vpop.f32.mrb[14].mxu0  ;;  %v1378_v22 = vpop.f32.mrb[12].mxu1 }
 0x110   :  { %v1318_v23 = vpop.f32.mrb[15].mxu0  ;;  %v1379_v26 = vpop.f32.mrb[13].mxu1 }
 0x111   :  { %v672_v24 = vadd.f32 %v1316_v20, %v2152_v34  ;;  %v1319_v25 = vadd.f32 %v1318_v23, %v1317_v21  ;;  %v1380_v27 = vadd.f32 %v1379_v26, %v1378_v22  ;;  %v1381_v28 = vpop.f32.mrb[14].mxu1 }
 0x112   :  { %v1382_v30 = vpop.f32.mrb[15].mxu1 }
 0x113   :  { %v675_v29 = vadd.f32 %v1319_v25, %v2152_v34  ;;  %v2174_v31 = vadd.f32 %v1380_v27, %v672_v24  ;;  %v1383_v32 = vadd.f32 %v1382_v30, %v1381_v28 }
 0x115   :  { %v1320_v33 = vpop.f32.mrb[16].mxu0  ;;  %v2176_v35 = vadd.f32 %v1383_v32, %v675_v29 }
 0x116   :  { %v1321_v36 = vpop.f32.mrb[17].mxu0 }
 0x117   :  { %v1322_v37 = vadd.f32 %v1321_v36, %v1320_v33  ;;  %v1323_v38 = vpop.f32.mrb[18].mxu0  ;;  %v1384_v39 = vpop.f32.mrb[16].mxu1 }
 0x118   :  { %v1324_v40 = vpop.f32.mrb[19].mxu0  ;;  %v1385_v43 = vpop.f32.mrb[17].mxu1 }
 0x119   :  { %v680_v41 = vadd.f32 %v1322_v37, %v2152_v34  ;;  %v1325_v42 = vadd.f32 %v1324_v40, %v1323_v38  ;;  %v1386_v44 = vadd.f32 %v1385_v43, %v1384_v39  ;;  %v1387_v45 = vpop.f32.mrb[18].mxu1 }
 0x11a   :  { %v1388_v48 = vpop.f32.mrb[19].mxu1 }
 0x11b   :  { %v683_v46 = vadd.f32 %v1325_v42, %v2152_v34  ;;  %v2180_v49 = vadd.f32 %v1386_v44, %v680_v41  ;;  %v1389_v51 = vadd.f32 %v1388_v48, %v1387_v45 }
 0x11d   :  { %v1326_v52 = vpop.f32.mrb[20].mxu0  ;;  %v2182_v53 = vadd.f32 %v1389_v51, %v683_v46 }
 0x11e   :  { %v1327_v54 = vpop.f32.mrb[21].mxu0 }
 0x11f   :  { %v1328_v55 = vadd.f32 %v1327_v54, %v1326_v52  ;;  %v1329_v56 = vpop.f32.mrb[22].mxu0  ;;  %v1390_v57 = vpop.f32.mrb[20].mxu1 }
 0x120   :  { %v1330_v58 = vpop.f32.mrb[23].mxu0  ;;  %v1391_v61 = vpop.f32.mrb[21].mxu1 }
 0x121   :  { %v688_v59 = vadd.f32 %v1328_v55, %v2152_v34  ;;  %v1331_v60 = vadd.f32 %v1330_v58, %v1329_v56  ;;  %v1392_v62 = vadd.f32 %v1391_v61, %v1390_v57  ;;  %v1393_v0 = vpop.f32.mrb[22].mxu1 }
 0x122   :  { %v1394_v3 = vpop.f32.mrb[23].mxu1 }
 0x123   :  { %v691_v1 = vadd.f32 %v1331_v60, %v2152_v34  ;;  %v2186_v4 = vadd.f32 %v1392_v62, %v688_v59  ;;  %v1395_v5 = vadd.f32 %v1394_v3, %v1393_v0 }
 0x125   :  { %v1332_v6 = vpop.f32.mrb[24].mxu0  ;;  %v2188_v7 = vadd.f32 %v1395_v5, %v691_v1 }
 0x126   :  { %v1333_v8 = vpop.f32.mrb[25].mxu0 }
 0x127   :  { %v1334_v9 = vadd.f32 %v1333_v8, %v1332_v6  ;;  %v1335_v10 = vpop.f32.mrb[26].mxu0  ;;  %v1396_v11 = vpop.f32.mrb[24].mxu1 }
 0x128   :  { %v1336_v12 = vpop.f32.mrb[27].mxu0  ;;  %v1397_v16 = vpop.f32.mrb[25].mxu1 }
 0x129   :  { %v696_v13 = vadd.f32 %v1334_v9, %v2152_v34  ;;  %v1337_v14 = vadd.f32 %v1336_v12, %v1335_v10  ;;  %v1398_v17 = vadd.f32 %v1397_v16, %v1396_v11  ;;  %v1399_v19 = vpop.f32.mrb[26].mxu1 }
 0x12a   :  { %v1400_v21 = vpop.f32.mrb[27].mxu1 }
 0x12b   :  { %v699_v20 = vadd.f32 %v1337_v14, %v2152_v34  ;;  %v2192_v22 = vadd.f32 %v1398_v17, %v696_v13  ;;  %v1401_v23 = vadd.f32 %v1400_v21, %v1399_v19 }
 0x12d   :  { %v1338_v24 = vpop.f32.mrb[28].mxu0  ;;  %v2194_v25 = vadd.f32 %v1401_v23, %v699_v20 }
 0x12e   :  { %v1339_v26 = vpop.f32.mrb[29].mxu0 }
 0x12f   :  { %v1340_v27 = vadd.f32 %v1339_v26, %v1338_v24  ;;  %v1341_v28 = vpop.f32.mrb[30].mxu0  ;;  %v1402_v29 = vpop.f32.mrb[28].mxu1 }
 0x130   :  { %v1342_v30 = vpop.f32.mrb[31].mxu0  ;;  %v1403_v36 = vpop.f32.mrb[29].mxu1 }
 0x131   :  { %v704_v32 = vadd.f32 %v1340_v27, %v2152_v34  ;;  %v1343_v33 = vadd.f32 %v1342_v30, %v1341_v28  ;;  %v1404_v37 = vadd.f32 %v1403_v36, %v1402_v29  ;;  %v1405_v38 = vpop.f32.mrb[30].mxu1 }
 0x132   :  { %v1406_v40 = vpop.f32.mrb[31].mxu1 }
 0x133   :  { %v707_v39 = vadd.f32 %v1343_v33, %v2152_v34  ;;  %v2198_v41 = vadd.f32 %v1404_v37, %v704_v32  ;;  %v1407_v42 = vadd.f32 %v1406_v40, %v1405_v38 }
 0x135   :  { %v1424_v43 = vpop.f32.mrb[32].mxu0  ;;  %v2200_v44 = vadd.f32 %v1407_v42, %v707_v39 }
 0x136   :  { %v1425_v45 = vpop.f32.mrb[33].mxu0 }
 0x137   :  { %v1426_v46 = vadd.f32 %v1425_v45, %v1424_v43  ;;  %v1427_v48 = vpop.f32.mrb[34].mxu0  ;;  %v1501_v52 = vpop.f32.mrb[32].mxu1 }
 0x138   :  { %v1428_v51 = vpop.f32.mrb[35].mxu0  ;;  %v938_v56 = vpop.f32.mrb[33].mxu1 }
 0x139   :  { %v1429_v54 = vadd.f32 %v1428_v51, %v1427_v48  ;;  %v842_v55 = vadd.f32 %v1426_v46, %v2156_v47  ;;  %v1502_v57 = vpop.f32.mrb[34].mxu1 }
 0x13a   :  { %v941_v59 = vpop.f32.mrb[35].mxu1 }
 0x13b   :  { %v939_v58 = vadd.f32 %v938_v56, %v842_v55  ;;  %v845_v34 = vadd.f32 %v1429_v54, %v2158_v50 }
 0x13d   :  { %v942_v60 = vadd.f32 %v941_v59, %v845_v34  ;;  %v1430_v61 = vpop.f32.mrb[36].mxu0  ;;  %v1001_v0 = vmax.f32 %v939_v58, 0.0 }
 0x13e   :  { %v1431_v62 = vpop.f32.mrb[37].mxu0 }
 0x13f   :  { %v1002_v1 = vmax.f32 %v942_v60, 0.0  ;;  %v1432_v3 = vadd.f32 %v1431_v62, %v1430_v61  ;;  %v1433_v5 = vpop.f32.mrb[38].mxu0  ;;  %v1505_v8 = vpop.f32.mrb[36].mxu1 }
 0x140   :  { %v1434_v6 = vpop.f32.mrb[39].mxu0  ;;  %v954_v47 = vpop.f32.mrb[37].mxu1 }
 0x141   :  { %v1017_v9 = vpack.c.bf16 %v1002_v1, %v1001_v0  ;;  %v850_v10 = vadd.f32 %v1432_v3, %v2162_v63  ;;  %v1435_v11 = vadd.f32 %v1434_v6, %v1433_v5  ;;  %v1506_v12 = vpop.f32.mrb[38].mxu1 }
 0x142   :  { %v957_v50 = vpop.f32.mrb[39].mxu1 }
 0x143   :  { %v947_v13 = vadd.f32 %v1501_v52, %v850_v10  ;;  %v853_v14 = vadd.f32 %v1435_v11, %v2164_v2  ;;  %1531 = vmatprep.mubr.bf16.mxu1 %v1017_v9 }
 0x145   :  { %v950_v16 = vadd.f32 %v1502_v57, %v853_v14  ;;  %v1436_v17 = vpop.f32.mrb[40].mxu0  ;;  %v1003_v20 = vmax.f32 %v947_v13, 0.0 }
 0x146   :  { %v1437_v19 = vpop.f32.mrb[41].mxu0 }
 0x147   :  { %v1004_v21 = vmax.f32 %v950_v16, 0.0  ;;  %v1438_v23 = vadd.f32 %v1437_v19, %v1436_v17  ;;  %v1439_v24 = vpop.f32.mrb[42].mxu0  ;;  %v1509_v27 = vpop.f32.mrb[40].mxu1 }
 0x148   :  { %v1440_v26 = vpop.f32.mrb[43].mxu0  ;;  %v970_v30 = vpop.f32.mrb[41].mxu1 }
 0x149   :  { %v1018_v28 = vpack.c.bf16 %v1004_v21, %v1003_v20  ;;  %v1441_v29 = vadd.f32 %v1440_v26, %v1439_v24  ;;  %v858_v63 = vadd.f32 %v1438_v23, %v2168_v15  ;;  %v1510_v32 = vpop.f32.mrb[42].mxu1 }
 0x14a   :  { %v973_v36 = vpop.f32.mrb[43].mxu1 }
 0x14b   :  { %v955_v33 = vadd.f32 %v954_v47, %v858_v63  ;;  %1532 = vmatmul.mubr.bf16.vlgmr.msra.gmra.mrb[48].mxu1 %v1018_v28  ;;  %v861_v2 = vadd.f32 %v1441_v29, %v2170_v18 }
 0x14d   :  { %v958_v37 = vadd.f32 %v957_v50, %v861_v2  ;;  %v1442_v38 = vpop.f32.mrb[44].mxu0  ;;  %v1005_v40 = vmax.f32 %v955_v33, 0.0 }
 0x14e   :  { %v1443_v39 = vpop.f32.mrb[45].mxu0 }
 0x14f   :  { %v1006_v42 = vmax.f32 %v958_v37, 0.0  ;;  %v1444_v43 = vadd.f32 %v1443_v39, %v1442_v38  ;;  %v1445_v45 = vpop.f32.mrb[46].mxu0  ;;  %v2208_v48 = vpop.f32.mrb[44].mxu1 }
 0x150   :  { %v1446_v46 = vpop.f32.mrb[47].mxu0  ;;  %v986_v54 = vpop.f32.mrb[45].mxu1 }
 0x151   :  { %v1019_v51 = vpack.c.bf16 %v1006_v42, %v1005_v40  ;;  %v866_v15 = vadd.f32 %v1444_v43, %v2174_v31  ;;  %v1447_v52 = vadd.f32 %v1446_v46, %v1445_v45  ;;  %v1514_v55 = vpop.f32.mrb[46].mxu1 }
 0x152   :  { %v989_v57 = vpop.f32.mrb[47].mxu1 }
 0x153   :  { %v963_v56 = vadd.f32 %v1505_v8, %v866_v15  ;;  %v869_v18 = vadd.f32 %v1447_v52, %v2176_v35  ;;  %1535 = vmatprep.mubr.bf16.mxu1 %v1019_v51 }
 0x155   :  { %v966_v58 = vadd.f32 %v1506_v12, %v869_v18  ;;  %v1448_v34 = vpop.f32.mrb[48].mxu0  ;;  %v1007_v60 = vmax.f32 %v963_v56, 0.0 }
 0x156   :  { %v1449_v59 = vpop.f32.mrb[49].mxu0 }
 0x157   :  { %v1008_v61 = vmax.f32 %v966_v58, 0.0  ;;  %v1450_v62 = vadd.f32 %v1449_v59, %v1448_v34  ;;  %v1451_v0 = vpop.f32.mrb[50].mxu0 }
 0x158   :  { %v1452_v1 = vpop.f32.mrb[51].mxu0 }
 0x159   :  { %v1453_v3 = vadd.f32 %v1452_v1, %v1451_v0  ;;  %v874_v5 = vadd.f32 %v1450_v62, %v2180_v49  ;;  %v1020_v31 = vpack.c.bf16 %v1008_v61, %v1007_v60 }
 0x15b   :  { %v971_v6 = vadd.f32 %v970_v30, %v874_v5  ;;  %1536 = vmatmul.mubr.bf16.gmra.mrb[52].mxu1 %v1020_v31  ;;  %v877_v8 = vadd.f32 %v1453_v3, %v2182_v53 }
 0x15d   :  { %v974_v9 = vadd.f32 %v973_v36, %v877_v8  ;;  %v1454_v35 = vpop.f32.mrb[52].mxu0  ;;  %v1009_v11 = vmax.f32 %v971_v6, 0.0 }
 0x15e   :  { %v1455_v10 = vpop.f32.mrb[53].mxu0 }
 0x15f   :  { %v1010_v47 = vmax.f32 %v974_v9, 0.0  ;;  %v1456_v12 = vadd.f32 %v1455_v10, %v1454_v35  ;;  %v1457_v13 = vpop.f32.mrb[54].mxu0 }
 0x160   :  { %v1458_v14 = vpop.f32.mrb[55].mxu0 }
 0x161   :  { %v1021_v50 = vpack.c.bf16 %v1010_v47, %v1009_v11  ;;  %v882_v16 = vadd.f32 %v1456_v12, %v2186_v4  ;;  %v1459_v17 = vadd.f32 %v1458_v14, %v1457_v13 }
 0x163   :  { %v979_v19 = vadd.f32 %v1509_v27, %v882_v16  ;;  %v885_v49 = vadd.f32 %v1459_v17, %v2188_v7  ;;  %1539 = vmatprep.mubr.bf16.mxu1 %v1021_v50 }
 0x165   :  { %v982_v20 = vadd.f32 %v1510_v32, %v885_v49  ;;  %v1460_v21 = vpop.f32.mrb[56].mxu0  ;;  %v1011_v53 = vmax.f32 %v979_v19, 0.0 }
 0x166   :  { %v1461_v23 = vpop.f32.mrb[57].mxu0 }
 0x167   :  { %v1012_v24 = vmax.f32 %v982_v20, 0.0  ;;  %v1462_v26 = vadd.f32 %v1461_v23, %v1460_v21  ;;  %v1463_v28 = vpop.f32.mrb[58].mxu0 }
 0x168   :  { %v1464_v29 = vpop.f32.mrb[59].mxu0 }
 0x169   :  { %v1465_v63 = vadd.f32 %v1464_v29, %v1463_v28  ;;  %v890_v30 = vadd.f32 %v1462_v26, %v2192_v22  ;;  %v1022_v33 = vpack.c.bf16 %v1012_v24, %v1011_v53 }
 0x16b   :  { %v987_v2 = vadd.f32 %v986_v54, %v890_v30  ;;  %1540 = vmatmul.mubr.bf16.gmra.mrb[56].mxu1 %v1022_v33  ;;  %v893_v4 = vadd.f32 %v1465_v63, %v2194_v25  ;;  %v1271_v54 = vld [vmem:[%s2276_s4] ss:$0 sm:$0xff] }
 0x16d   :  { %v990_v27 = vadd.f32 %v989_v57, %v893_v4  ;;  %v1466_v36 = vpop.f32.mrb[60].mxu0  ;;  %v1013_v37 = vmax.f32 %v987_v2, 0.0 }
 0x16e   :  { %v1467_v7 = vpop.f32.mrb[61].mxu0 }
 0x16f   :  { %v1014_v32 = vmax.f32 %v990_v27, 0.0  ;;  %v1468_v38 = vadd.f32 %v1467_v7, %v1466_v36  ;;  %v1469_v39 = vpop.f32.mrb[62].mxu0 }
 0x170   :  { %v1470_v40 = vpop.f32.mrb[63].mxu0 }
 0x171   :  { %v1023_v42 = vpack.c.bf16 %v1014_v32, %v1013_v37  ;;  %v898_v43 = vadd.f32 %v1468_v38, %v2198_v41  ;;  %v1471_v45 = vadd.f32 %v1470_v40, %v1469_v39 }
 0x173   :  { %v995_v46 = vadd.f32 %v2208_v48, %v898_v43  ;;  %v901_v22 = vadd.f32 %v1471_v45, %v2200_v44  ;;  %1543 = vmatprep.mubr.bf16.mxu1 %v1023_v42 }
 0x175   :  { %v998_v51 = vadd.f32 %v1514_v55, %v901_v22  ;;  %v1015_v15 = vmax.f32 %v995_v46, 0.0 }
 0x177   :  { %v1016_v25 = vmax.f32 %v998_v51, 0.0 }
 0x179   :  { %v1024_v52 = vpack.c.bf16 %v1016_v25, %v1015_v15 }
 0x17b   :  { %1544 = vmatmul.mubr.bf16.gmra.mrb[60].mxu1 %v1024_v52 }
 0x21e   :  { %v1533_v56 = vpop.f32.mrb[48].mxu1 }
 0x21f   :  { %v1139_v18 = vadd.f32 %v1533_v56, %v1271_v54  ;;  %v1130_v57 = vpop.f32.mrb[49].mxu1 }
 0x220   :  { %v1131_v58 = vadd.f32 %v1271_v54, %v1130_v57  ;;  %v1534_v41 = vpop.f32.mrb[50].mxu1 }
 0x221   :  { %1195 = vst [vmem:[%s2277_s5 + $0x10] sm:$0xff] %v1139_v18  ;;  %v1142_v44 = vadd.f32 %v1534_v41, %v1271_v54  ;;  %v1133_v48 = vpop.f32.mrb[51].mxu1 }
 0x222   :  { %1193 = vst [vmem:[%s2277_s5] sm:$0xff] %v1131_v58  ;;  %v1134_v55 = vadd.f32 %v1271_v54, %v1133_v48 }
 0x223   :  { %1196 = vst [vmem:[%s2277_s5 + $0x18] sm:$0xff] %v1142_v44 }
 0x224   :  { %1194 = vst [vmem:[%s2277_s5 + $0x8] sm:$0xff] %v1134_v55 }
 0x22e   :  { %v1537_v34 = vpop.f32.mrb[52].mxu1 }
 0x22f   :  { %v1155_v59 = vadd.f32 %v1537_v34, %v1271_v54  ;;  %v1146_v60 = vpop.f32.mrb[53].mxu1 }
 0x230   :  { %v1147_v61 = vadd.f32 %v1271_v54, %v1146_v60  ;;  %v1538_v62 = vpop.f32.mrb[54].mxu1 }
 0x231   :  { %1199 = vst [vmem:[%s2277_s5 + $0x30] sm:$0xff] %v1155_v59  ;;  %v1158_v0 = vadd.f32 %v1538_v62, %v1271_v54  ;;  %v1149_v1 = vpop.f32.mrb[55].mxu1 }
 0x232   :  { %1197 = vst [vmem:[%s2277_s5 + $0x20] sm:$0xff] %v1147_v61  ;;  %v1150_v3 = vadd.f32 %v1271_v54, %v1149_v1 }
 0x233   :  { %1200 = vst [vmem:[%s2277_s5 + $0x38] sm:$0xff] %v1158_v0 }
 0x234   :  { %1198 = vst [vmem:[%s2277_s5 + $0x28] sm:$0xff] %v1150_v3 }
 0x23e   :  { %v1541_v5 = vpop.f32.mrb[56].mxu1 }
 0x23f   :  { %v1171_v31 = vadd.f32 %v1541_v5, %v1271_v54  ;;  %v1162_v6 = vpop.f32.mrb[57].mxu1 }
 0x240   :  { %v1163_v8 = vadd.f32 %v1271_v54, %v1162_v6  ;;  %v1542_v9 = vpop.f32.mrb[58].mxu1 }
 0x241   :  { %1203 = vst [vmem:[%s2277_s5 + $0x50] sm:$0xff] %v1171_v31  ;;  %v1174_v35 = vadd.f32 %v1542_v9, %v1271_v54  ;;  %v1165_v10 = vpop.f32.mrb[59].mxu1 }
 0x242   :  { %1201 = vst [vmem:[%s2277_s5 + $0x40] sm:$0xff] %v1163_v8  ;;  %v1166_v11 = vadd.f32 %v1271_v54, %v1165_v10 }
 0x243   :  { %1204 = vst [vmem:[%s2277_s5 + $0x58] sm:$0xff] %v1174_v35 }
 0x244   :  { %1202 = vst [vmem:[%s2277_s5 + $0x48] sm:$0xff] %v1166_v11 }
 0x24e   :  { %v1545_v47 = vpop.f32.mrb[60].mxu1 }
 0x24f   :  { %v1187_v12 = vadd.f32 %v1545_v47, %v1271_v54  ;;  %v1178_v13 = vpop.f32.mrb[61].mxu1 }
 0x250   :  { %v1179_v14 = vadd.f32 %v1271_v54, %v1178_v13  ;;  %v1546_v50 = vpop.f32.mrb[62].mxu1 }
 0x251   :  { %1207 = vst [vmem:[%s2277_s5 + $0x70] sm:$0xff] %v1187_v12  ;;  %v1190_v16 = vadd.f32 %v1546_v50, %v1271_v54  ;;  %v1181_v17 = vpop.f32.mrb[63].mxu1 }
 0x252   :  { %1205 = vst [vmem:[%s2277_s5 + $0x60] sm:$0xff] %v1179_v14  ;;  %v1182_v19 = vadd.f32 %v1271_v54, %v1181_v17 }
 0x253   :  { %1208 = vst [vmem:[%s2277_s5 + $0x78] sm:$0xff] %v1190_v16 }
 0x254   :  { %1206 = vst [vmem:[%s2277_s5 + $0x68] sm:$0xff] %v1182_v19 }

</bundles_post_ra>
